<compile_context>
chip_gen: v5e
topology: v5e:2x2
jax: 0.10.0
libtpu: 0.0.40
codegen_flags: <defaults>
</compile_context>

<pallas_src>
import functools

import jax
import jax.numpy as jnp
from jax import lax
from jax.experimental import pallas as pl
from jax.experimental.pallas import tpu as pltpu


# -----------------------------------------------------------------------------
# Packed-parameter slab layout (pure-Python ints, shared by packer and kernel)
# -----------------------------------------------------------------------------
def _round_up8(n: int) -> int:
    return ((n + 7) // 8) * 8


def _build_layout(sections):
    """sections: [(name, rows, cols)] -> ({name: (row_off, rows, cols)}, rows, width).

    Every section start is 8-row (sublane) aligned so all in-kernel static
    slices begin on a sublane-tile boundary (no relayout copies)."""
    lay, off, width = {}, 0, 0
    for name, rows, cols in sections:
        lay[name] = (off, rows, cols)
        off += _round_up8(rows)
        width = max(width, cols)
    return lay, off, width


def _subnet_sections(in_c, hid_c, out_c, n_heads, n_nodes, batch, n_classes,
                     with_lin3_bias):
    dh = n_heads * hid_c
    bn = batch * n_nodes
    secs = [
        ("w_h", in_c, dh),      # stacked per-head projection weights  [C, H*hid]
        ("b_h", 1, dh),         # stacked per-head biases              [1, H*hid]
        ("w_o", dh, out_c),     # out-layer projection                 [H*hid, out_c]
        ("b_o", 1, out_c),      # out-layer bias                       [1, out_c]
        ("mask", bn, bn),       # block-diagonal 0/1 graph             [B*N, B*N]
        ("g", bn, n_classes),   # linear3 weight rows, tiled per batch [B*N, n_classes]
        ("sel", batch, bn),     # 0/1 per-batch segment selector       [B, B*N]
    ]
    if with_lin3_bias:
        secs.append(("b3", 1, n_classes))   # linear3 bias             [1, n_classes]
    return secs


# -----------------------------------------------------------------------------
# In-kernel helpers (all shapes / slice bounds are static Python ints)
# -----------------------------------------------------------------------------
def _take(ref, lay, name):
    off, rows, cols = lay[name]
    return ref[off:off + rows, 0:cols]


def _leaky(x, neg_slope):
    return jnp.where(x > 0, x, neg_slope * x)


def _attend(h, mask):
    """One GraphAttentionLayer attention (single head) on the flattened batch.

    h: [B*N, d], mask: block-diagonal 0/1 graph [B*N, B*N].
    Cross-batch entries are zeroed by the mask, filled with -1e16 and underflow
    to exactly 0 in the softmax, so this matches the per-batch torch bmm path.
    """
    # scores = h @ h^T (contract the feature dim of both operands).
    s = lax.dot_general(h, h, (((1,), (1,)), ((), ())),
                        preferred_element_type=jnp.float32)
    s = s * mask
    s = jnp.where(s == 0.0, -1e16, s)     # torch parity: masked_fill(scores==0)
    m = jnp.max(s, axis=-1, keepdims=True)
    e = jnp.exp(s - m)
    inv = pl.reciprocal(jnp.sum(e, axis=-1, keepdims=True), approx=True)  # EUP
    attn = e * inv
    return jnp.dot(attn, h, preferred_element_type=jnp.float32)


def _gat_subnet(x, slab_ref, lay, n_heads, hid_c, neg_slope):
    """GATSubNet on the flattened batch: heads -> concat(+bias) -> LeakyReLU ->
    out layer (+bias) -> LeakyReLU.  Returns [B*N, out_c]."""
    mask = _take(slab_ref, lay, "mask")
    w_h = _take(slab_ref, lay, "w_h")
    b_h = _take(slab_ref, lay, "b_h")
    w_o = _take(slab_ref, lay, "w_o")
    b_o = _take(slab_ref, lay, "b_o")

    # One fused projection for every head: [B*N, C] @ [C, H*hid].
    h = jnp.dot(x, w_h, preferred_element_type=jnp.float32)
    outs = [_attend(h[:, i * hid_c:(i + 1) * hid_c], mask) for i in range(n_heads)]
    cat = outs[0] if n_heads == 1 else jnp.concatenate(outs, axis=-1)
    act = _leaky(cat + b_h, neg_slope)          # bias-per-head then LeakyReLU

    h2 = jnp.dot(act, w_o, preferred_element_type=jnp.float32)   # [B*N, out_c]
    out = _attend(h2, mask) + b_o
    return _leaky(out, neg_slope)


# -----------------------------------------------------------------------------
# Fused Pallas kernel: subnet1 + subnet2 + Linear(22, 9), one grid step
# -----------------------------------------------------------------------------
def gatnet_kernel(x1_ref, x2_ref, s1_ref, s2_ref, out_ref, *,
                  lay1, lay2, heads1, hid1, heads2, hid2, neg_slope):
    o1 = _gat_subnet(x1_ref[...], s1_ref, lay1, heads1, hid1, neg_slope)  # [B*N1,1]
    o2 = _gat_subnet(x2_ref[...], s2_ref, lay2, heads2, hid2, neg_slope)  # [B*N2,1]

    # Fused linear3 epilogue.  Because out_c == 1, flatten+concat+Linear is
    # expressed as two small matmuls against precomputed (selector, tiled
    # weight) slabs -- no in-kernel reshape / transpose / concat is needed:
    #   result[b, c] = sum_n o1[b*N1+n] * W3[n, c]
    #                + sum_m o2[b*N2+m] * W3[N1+m, c] + b3[c]
    g1, sel1 = _take(s1_ref, lay1, "g"), _take(s1_ref, lay1, "sel")
    g2, sel2 = _take(s2_ref, lay2, "g"), _take(s2_ref, lay2, "sel")
    b3 = _take(s1_ref, lay1, "b3")
    res = (jnp.dot(sel1, o1 * g1, preferred_element_type=jnp.float32)
           + jnp.dot(sel2, o2 * g2, preferred_element_type=jnp.float32)
           + b3)
    out_ref[...] = res


def _vmem_spec():
    return pl.BlockSpec(memory_space=pltpu.MemorySpace.VMEM)


# -----------------------------------------------------------------------------
# Forward wrapper: one pallas_call, nothing else
# -----------------------------------------------------------------------------
@functools.partial(jax.jit, static_argnames=(
    "heads1", "hid1", "out1", "heads2", "hid2", "out2", "n_classes"))
def gatnet_forward(packed, data1, data2, *, heads1, hid1, out1,
                   heads2, hid2, out2, n_classes):
    """GATNet.forward (device arg dropped; linear1/linear2 are dead code)."""
    B, N1, C1 = data1.shape
    _, N2, C2 = data2.shape

    # flow.view(B, N, -1), then flatten the batch onto the node axis (free,
    # row-major) so the kernel only sees plain 2-D operands.
    x1 = data1.reshape(B * N1, C1).astype(jnp.float32)
    x2 = data2.reshape(B * N2, C2).astype(jnp.float32)

    lay1, rows1, w1 = _build_layout(
        _subnet_sections(C1, hid1, out1, heads1, N1, B, n_classes, True))
    lay2, rows2, w2 = _build_layout(
        _subnet_sections(C2, hid2, out2, heads2, N2, B, n_classes, False))
    assert packed["slab1"].shape == (rows1, w1), packed["slab1"].shape
    assert packed["slab2"].shape == (rows2, w2), packed["slab2"].shape

    kernel = functools.partial(
        gatnet_kernel, lay1=lay1, lay2=lay2,
        heads1=heads1, hid1=hid1, heads2=heads2, hid2=hid2,
        neg_slope=0.01)   # Python float -> no captured jnp constants

    return pl.pallas_call(
        kernel,
        out_shape=jax.ShapeDtypeStruct((B, n_classes), jnp.float32),
        in_specs=[_vmem_spec()] * 4,
        out_specs=_vmem_spec(),
    )(x1, x2, packed["slab1"], packed["slab2"])


# -----------------------------------------------------------------------------
# Deterministic parameter init (mirrors the torch module's parameter shapes)
# -----------------------------------------------------------------------------
def init_params(key, in_c, hid_c, out_c, n_heads, n1, n2, n_classes):
    ks = jax.random.split(key, 5)

    def layer(k, ci, co):            # GraphAttentionLayer: W (no bias) + b
        kw, kb = jax.random.split(k)
        return (jax.random.normal(kw, (ci, co), jnp.float32),   # nn.init.normal_
                jax.random.normal(kb, (co,), jnp.float32))

    def subnet(k, ci, hc, co, nh):
        kk = jax.random.split(k, nh + 1)
        heads = [layer(kk[i], ci, hc) for i in range(nh)]
        wo, bo = layer(kk[-1], hc * nh, co)
        return {"w_heads": jnp.concatenate([w for w, _ in heads], axis=1),
                "b_heads": jnp.concatenate([b for _, b in heads]).reshape(1, -1),
                "w_out": wo, "b_out": bo.reshape(1, -1)}

    def graph(k, n):                 # binary adjacency with self loops
        return (jax.random.bernoulli(k, 0.5, (n, n)).astype(jnp.float32)
                + jnp.eye(n, dtype=jnp.float32)).clip(0.0, 1.0)

    return {
        "subnet1": subnet(ks[0], in_c, hid_c, out_c, n_heads),
        "subnet2": subnet(ks[1], 1, 8, 1, 2),
        "graph1": graph(ks[3], n1),
        "graph2": graph(ks[4], n2),
        "lin3_w": jax.random.normal(ks[2], (n1 * out_c + n2, n_classes),
                                    jnp.float32) * 0.1,
        "lin3_b": jnp.zeros((n_classes,), jnp.float32),
    }


def _pack_subnet(sub, graph, lin3_w_slice, lin3_b, batch, n_heads, n_classes,
                 with_lin3_bias):
    in_c, dh = sub["w_heads"].shape
    out_c = sub["w_out"].shape[1]
    n = graph.shape[0]
    assert dh % n_heads == 0
    assert out_c == 1, "fused Linear(22,9) epilogue assumes out_c == 1"
    secs = _subnet_sections(in_c, dh // n_heads, out_c, n_heads, n, batch,
                            n_classes, with_lin3_bias)
    lay, rows, width = _build_layout(secs)

    eye_b = jnp.eye(batch, dtype=jnp.float32)
    vals = {
        "w_h": sub["w_heads"],
        "b_h": sub["b_heads"],
        "w_o": sub["w_out"],
        "b_o": sub["b_out"],
        "mask": jnp.kron(eye_b, graph),                           # block-diag graph
        "g": jnp.tile(lin3_w_slice, (batch, 1)),                  # W3 rows per node
        "sel": jnp.kron(eye_b, jnp.ones((1, n), jnp.float32)),    # batch selector
    }
    if with_lin3_bias:
        vals["b3"] = lin3_b.reshape(1, -1)

    slab = jnp.zeros((rows, width), jnp.float32)
    for name, (off, r, c) in lay.items():
        slab = slab.at[off:off + r, 0:c].set(
            vals[name].astype(jnp.float32).reshape(r, c))
    return slab


def pack_params(raw, *, batch, n_heads1, n_heads2):
    """One-time parameter prep: pack each subnet's weights + block-diag graph +
    fused-epilogue constants into a single VMEM slab."""
    n1, n2 = raw["graph1"].shape[0], raw["graph2"].shape[0]
    out_c1 = raw["subnet1"]["w_out"].shape[1]
    n_classes = raw["lin3_w"].shape[1]
    w3_1 = raw["lin3_w"][:n1 * out_c1, :]
    w3_2 = raw["lin3_w"][n1 * out_c1:, :]
    return {
        "slab1": _pack_subnet(raw["subnet1"], raw["graph1"], w3_1,
                              raw["lin3_b"], batch, n_heads1, n_classes, True),
        "slab2": _pack_subnet(raw["subnet2"], raw["graph2"], w3_2,
                              raw["lin3_b"], batch, n_heads2, n_classes, False),
    }


# -----------------------------------------------------------------------------
if __name__ == "__main__":
    # Shapes implied by the module: linear3 = Linear(22, 9) and the two flattened
    # predictions concatenate to 22  ->  N1=12, out_c=1, N2=10.
    B = 2
    N1, IN_C, HID_C, OUT_C, N_HEADS = 12, 6, 16, 1, 2
    N2, IN_C2, HID_C2, OUT_C2, N_HEADS2 = 10, 1, 8, 1, 2
    N_CLASSES = 9

    key = jax.random.PRNGKey(0)
    kp, kd1, kd2 = jax.random.split(key, 3)

    raw = init_params(kp, IN_C, HID_C, OUT_C, N_HEADS, N1, N2, N_CLASSES)
    packed = pack_params(raw, batch=B, n_heads1=N_HEADS, n_heads2=N_HEADS2)

    data1 = jax.random.normal(kd1, (B, N1, IN_C), jnp.float32)    # [2, 12, 6]
    data2 = jax.random.normal(kd2, (B, N2, IN_C2), jnp.float32)   # [2, 10, 1]

    out = gatnet_forward(packed, data1, data2,
                         heads1=N_HEADS, hid1=HID_C, out1=OUT_C,
                         heads2=N_HEADS2, hid2=HID_C2, out2=OUT_C2,
                         n_classes=N_CLASSES)
    out = jax.block_until_ready(out)
    assert out.shape == (B, N_CLASSES), out.shape
    print("KERNEL_OK")
</pallas_src>

<mosaic_0001>
module attributes {stable_mosaic.version = 11 : i64} {
  func.func @gatnet_kernel(%arg0: memref<24x6xf32, #tpu.memory_space<vmem>>, %arg1: memref<20x1xf32, #tpu.memory_space<vmem>>, %arg2: memref<120x32xf32, #tpu.memory_space<vmem>>, %arg3: memref<96x20xf32, #tpu.memory_space<vmem>>, %arg4: memref<2x9xf32, #tpu.memory_space<vmem>>) attributes {dimension_semantics = [], scalar_prefetch = 0 : i64, scratch_operands = 0 : i64, tpu.core_type = #tpu.core_type<tc>} {
    %c0 = arith.constant 0 : index
    %c0_0 = arith.constant 0 : index
    %0 = vector.load %arg0[%c0, %c0_0] : memref<24x6xf32, #tpu.memory_space<vmem>>, vector<24x6xf32>
    %c56 = arith.constant 56 : index
    %c0_1 = arith.constant 0 : index
    %1 = vector.load %arg2[%c56, %c0_1] : memref<120x32xf32, #tpu.memory_space<vmem>>, vector<24x24xf32>
    %c0_2 = arith.constant 0 : index
    %c0_3 = arith.constant 0 : index
    %2 = vector.load %arg2[%c0_2, %c0_3] : memref<120x32xf32, #tpu.memory_space<vmem>>, vector<6x32xf32>
    %c8 = arith.constant 8 : index
    %c0_4 = arith.constant 0 : index
    %3 = vector.load %arg2[%c8, %c0_4] : memref<120x32xf32, #tpu.memory_space<vmem>>, vector<1x32xf32>
    %c16 = arith.constant 16 : index
    %c0_5 = arith.constant 0 : index
    %4 = vector.load %arg2[%c16, %c0_5] : memref<120x32xf32, #tpu.memory_space<vmem>>, vector<32x1xf32>
    %c48 = arith.constant 48 : index
    %c0_6 = arith.constant 0 : index
    %5 = vector.load %arg2[%c48, %c0_6] : memref<120x32xf32, #tpu.memory_space<vmem>>, vector<1x1xf32>
    %cst = arith.constant dense<0.000000e+00> : vector<24x32xf32>
    %6 = tpu.matmul %0, %2, %cst {dimension_numbers = #tpu.dot_dimension_numbers<[1], [0], [0], [1], [0, 0, 1, 1], [], []>} : vector<24x6xf32>, vector<6x32xf32>, vector<24x32xf32> -> vector<24x32xf32>
    %7 = vector.extract_strided_slice %6 {offsets = [0, 0], sizes = [24, 16], strides = [1, 1]} : vector<24x32xf32> to vector<24x16xf32>
    %cst_7 = arith.constant dense<0.000000e+00> : vector<24x24xf32>
    %8 = tpu.matmul %7, %7, %cst_7 {dimension_numbers = #tpu.dot_dimension_numbers<[1], [1], [0], [0], [0, 0, 1, 0], [], []>} : vector<24x16xf32>, vector<24x16xf32>, vector<24x24xf32> -> vector<24x24xf32>
    %9 = arith.mulf %8, %1 : vector<24x24xf32>
    %cst_8 = arith.constant 0.000000e+00 : f32
    %10 = vector.broadcast %cst_8 : f32 to vector<24x24xf32>
    %11 = arith.cmpf oeq, %9, %10 : vector<24x24xf32>
    %cst_9 = arith.constant -1.000000e+16 : f32
    %12 = vector.broadcast %cst_9 : f32 to vector<24x24xf32>
    %13 = arith.select %11, %12, %9 : vector<24x24xi1>, vector<24x24xf32>
    %cst_10 = arith.constant dense<0xFF800000> : vector<24xf32>
    %14 = vector.multi_reduction <maximumf>, %13, %cst_10 [1] : vector<24x24xf32> to vector<24xf32>
    %15 = vector.shape_cast %14 : vector<24xf32> to vector<24x1xf32>
    %16 = vector.broadcast %15 : vector<24x1xf32> to vector<24x24xf32>
    %17 = arith.subf %13, %16 : vector<24x24xf32>
    %18 = math.exp %17 : vector<24x24xf32>
    %cst_11 = arith.constant dense<0.000000e+00> : vector<24xf32>
    %19 = vector.multi_reduction <add>, %18, %cst_11 [1] : vector<24x24xf32> to vector<24xf32>
    %20 = vector.shape_cast %19 : vector<24xf32> to vector<24x1xf32>
    %21 = tpu.reciprocal %20 {approx = true} : vector<24x1xf32> -> vector<24x1xf32>
    %22 = vector.broadcast %21 : vector<24x1xf32> to vector<24x24xf32>
    %23 = arith.mulf %18, %22 : vector<24x24xf32>
    %cst_12 = arith.constant dense<0.000000e+00> : vector<24x16xf32>
    %24 = tpu.matmul %23, %7, %cst_12 {dimension_numbers = #tpu.dot_dimension_numbers<[1], [0], [0], [1], [0, 0, 1, 1], [], []>} : vector<24x24xf32>, vector<24x16xf32>, vector<24x16xf32> -> vector<24x16xf32>
    %25 = vector.extract_strided_slice %6 {offsets = [0, 16], sizes = [24, 16], strides = [1, 1]} : vector<24x32xf32> to vector<24x16xf32>
    %cst_13 = arith.constant dense<0.000000e+00> : vector<24x24xf32>
    %26 = tpu.matmul %25, %25, %cst_13 {dimension_numbers = #tpu.dot_dimension_numbers<[1], [1], [0], [0], [0, 0, 1, 0], [], []>} : vector<24x16xf32>, vector<24x16xf32>, vector<24x24xf32> -> vector<24x24xf32>
    %27 = arith.mulf %26, %1 : vector<24x24xf32>
    %cst_14 = arith.constant 0.000000e+00 : f32
    %28 = vector.broadcast %cst_14 : f32 to vector<24x24xf32>
    %29 = arith.cmpf oeq, %27, %28 : vector<24x24xf32>
    %cst_15 = arith.constant -1.000000e+16 : f32
    %30 = vector.broadcast %cst_15 : f32 to vector<24x24xf32>
    %31 = arith.select %29, %30, %27 : vector<24x24xi1>, vector<24x24xf32>
    %cst_16 = arith.constant dense<0xFF800000> : vector<24xf32>
    %32 = vector.multi_reduction <maximumf>, %31, %cst_16 [1] : vector<24x24xf32> to vector<24xf32>
    %33 = vector.shape_cast %32 : vector<24xf32> to vector<24x1xf32>
    %34 = vector.broadcast %33 : vector<24x1xf32> to vector<24x24xf32>
    %35 = arith.subf %31, %34 : vector<24x24xf32>
    %36 = math.exp %35 : vector<24x24xf32>
    %cst_17 = arith.constant dense<0.000000e+00> : vector<24xf32>
    %37 = vector.multi_reduction <add>, %36, %cst_17 [1] : vector<24x24xf32> to vector<24xf32>
    %38 = vector.shape_cast %37 : vector<24xf32> to vector<24x1xf32>
    %39 = tpu.reciprocal %38 {approx = true} : vector<24x1xf32> -> vector<24x1xf32>
    %40 = vector.broadcast %39 : vector<24x1xf32> to vector<24x24xf32>
    %41 = arith.mulf %36, %40 : vector<24x24xf32>
    %cst_18 = arith.constant dense<0.000000e+00> : vector<24x16xf32>
    %42 = tpu.matmul %41, %25, %cst_18 {dimension_numbers = #tpu.dot_dimension_numbers<[1], [0], [0], [1], [0, 0, 1, 1], [], []>} : vector<24x24xf32>, vector<24x16xf32>, vector<24x16xf32> -> vector<24x16xf32>
    %43 = tpu.concatenate %24, %42 in 1 : vector<24x16xf32>, vector<24x16xf32> -> vector<24x32xf32>
    %44 = vector.broadcast %3 : vector<1x32xf32> to vector<24x32xf32>
    %45 = arith.addf %43, %44 : vector<24x32xf32>
    %cst_19 = arith.constant 0.000000e+00 : f32
    %46 = vector.broadcast %cst_19 : f32 to vector<24x32xf32>
    %47 = arith.cmpf ogt, %45, %46 : vector<24x32xf32>
    %cst_20 = arith.constant 0.00999999977 : f32
    %48 = vector.broadcast %cst_20 : f32 to vector<24x32xf32>
    %49 = arith.mulf %48, %45 : vector<24x32xf32>
    %50 = arith.select %47, %45, %49 : vector<24x32xi1>, vector<24x32xf32>
    %cst_21 = arith.constant dense<0.000000e+00> : vector<24x1xf32>
    %51 = tpu.matmul %50, %4, %cst_21 {dimension_numbers = #tpu.dot_dimension_numbers<[1], [0], [0], [1], [0, 0, 1, 1], [], []>} : vector<24x32xf32>, vector<32x1xf32>, vector<24x1xf32> -> vector<24x1xf32>
    %cst_22 = arith.constant dense<0.000000e+00> : vector<24x24xf32>
    %52 = tpu.matmul %51, %51, %cst_22 {dimension_numbers = #tpu.dot_dimension_numbers<[1], [1], [0], [0], [0, 0, 1, 0], [], []>} : vector<24x1xf32>, vector<24x1xf32>, vector<24x24xf32> -> vector<24x24xf32>
    %53 = arith.mulf %52, %1 : vector<24x24xf32>
    %cst_23 = arith.constant 0.000000e+00 : f32
    %54 = vector.broadcast %cst_23 : f32 to vector<24x24xf32>
    %55 = arith.cmpf oeq, %53, %54 : vector<24x24xf32>
    %cst_24 = arith.constant -1.000000e+16 : f32
    %56 = vector.broadcast %cst_24 : f32 to vector<24x24xf32>
    %57 = arith.select %55, %56, %53 : vector<24x24xi1>, vector<24x24xf32>
    %cst_25 = arith.constant dense<0xFF800000> : vector<24xf32>
    %58 = vector.multi_reduction <maximumf>, %57, %cst_25 [1] : vector<24x24xf32> to vector<24xf32>
    %59 = vector.shape_cast %58 : vector<24xf32> to vector<24x1xf32>
    %60 = vector.broadcast %59 : vector<24x1xf32> to vector<24x24xf32>
    %61 = arith.subf %57, %60 : vector<24x24xf32>
    %62 = math.exp %61 : vector<24x24xf32>
    %cst_26 = arith.constant dense<0.000000e+00> : vector<24xf32>
    %63 = vector.multi_reduction <add>, %62, %cst_26 [1] : vector<24x24xf32> to vector<24xf32>
    %64 = vector.shape_cast %63 : vector<24xf32> to vector<24x1xf32>
    %65 = tpu.reciprocal %64 {approx = true} : vector<24x1xf32> -> vector<24x1xf32>
    %66 = vector.broadcast %65 : vector<24x1xf32> to vector<24x24xf32>
    %67 = arith.mulf %62, %66 : vector<24x24xf32>
    %cst_27 = arith.constant dense<0.000000e+00> : vector<24x1xf32>
    %68 = tpu.matmul %67, %51, %cst_27 {dimension_numbers = #tpu.dot_dimension_numbers<[1], [0], [0], [1], [0, 0, 1, 1], [], []>} : vector<24x24xf32>, vector<24x1xf32>, vector<24x1xf32> -> vector<24x1xf32>
    %69 = vector.broadcast %5 : vector<1x1xf32> to vector<24x1xf32>
    %70 = arith.addf %68, %69 : vector<24x1xf32>
    %cst_28 = arith.constant 0.000000e+00 : f32
    %71 = vector.broadcast %cst_28 : f32 to vector<24x1xf32>
    %72 = arith.cmpf ogt, %70, %71 : vector<24x1xf32>
    %cst_29 = arith.constant 0.00999999977 : f32
    %73 = vector.broadcast %cst_29 : f32 to vector<24x1xf32>
    %74 = arith.mulf %73, %70 : vector<24x1xf32>
    %75 = arith.select %72, %70, %74 : vector<24x1xi1>, vector<24x1xf32>
    %c0_30 = arith.constant 0 : index
    %c0_31 = arith.constant 0 : index
    %76 = vector.load %arg1[%c0_30, %c0_31] : memref<20x1xf32, #tpu.memory_space<vmem>>, vector<20x1xf32>
    %c40 = arith.constant 40 : index
    %c0_32 = arith.constant 0 : index
    %77 = vector.load %arg3[%c40, %c0_32] : memref<96x20xf32, #tpu.memory_space<vmem>>, vector<20x20xf32>
    %c0_33 = arith.constant 0 : index
    %c0_34 = arith.constant 0 : index
    %78 = vector.load %arg3[%c0_33, %c0_34] : memref<96x20xf32, #tpu.memory_space<vmem>>, vector<1x16xf32>
    %c8_35 = arith.constant 8 : index
    %c0_36 = arith.constant 0 : index
    %79 = vector.load %arg3[%c8_35, %c0_36] : memref<96x20xf32, #tpu.memory_space<vmem>>, vector<1x16xf32>
    %c16_37 = arith.constant 16 : index
    %c0_38 = arith.constant 0 : index
    %80 = vector.load %arg3[%c16_37, %c0_38] : memref<96x20xf32, #tpu.memory_space<vmem>>, vector<16x1xf32>
    %c32 = arith.constant 32 : index
    %c0_39 = arith.constant 0 : index
    %81 = vector.load %arg3[%c32, %c0_39] : memref<96x20xf32, #tpu.memory_space<vmem>>, vector<1x1xf32>
    %cst_40 = arith.constant dense<0.000000e+00> : vector<20x16xf32>
    %82 = tpu.matmul %76, %78, %cst_40 {dimension_numbers = #tpu.dot_dimension_numbers<[1], [0], [0], [1], [0, 0, 1, 1], [], []>} : vector<20x1xf32>, vector<1x16xf32>, vector<20x16xf32> -> vector<20x16xf32>
    %83 = vector.extract_strided_slice %82 {offsets = [0, 0], sizes = [20, 8], strides = [1, 1]} : vector<20x16xf32> to vector<20x8xf32>
    %cst_41 = arith.constant dense<0.000000e+00> : vector<20x20xf32>
    %84 = tpu.matmul %83, %83, %cst_41 {dimension_numbers = #tpu.dot_dimension_numbers<[1], [1], [0], [0], [0, 0, 1, 0], [], []>} : vector<20x8xf32>, vector<20x8xf32>, vector<20x20xf32> -> vector<20x20xf32>
    %85 = arith.mulf %84, %77 : vector<20x20xf32>
    %cst_42 = arith.constant 0.000000e+00 : f32
    %86 = vector.broadcast %cst_42 : f32 to vector<20x20xf32>
    %87 = arith.cmpf oeq, %85, %86 : vector<20x20xf32>
    %cst_43 = arith.constant -1.000000e+16 : f32
    %88 = vector.broadcast %cst_43 : f32 to vector<20x20xf32>
    %89 = arith.select %87, %88, %85 : vector<20x20xi1>, vector<20x20xf32>
    %cst_44 = arith.constant dense<0xFF800000> : vector<20xf32>
    %90 = vector.multi_reduction <maximumf>, %89, %cst_44 [1] : vector<20x20xf32> to vector<20xf32>
    %91 = vector.shape_cast %90 : vector<20xf32> to vector<20x1xf32>
    %92 = vector.broadcast %91 : vector<20x1xf32> to vector<20x20xf32>
    %93 = arith.subf %89, %92 : vector<20x20xf32>
    %94 = math.exp %93 : vector<20x20xf32>
    %cst_45 = arith.constant dense<0.000000e+00> : vector<20xf32>
    %95 = vector.multi_reduction <add>, %94, %cst_45 [1] : vector<20x20xf32> to vector<20xf32>
    %96 = vector.shape_cast %95 : vector<20xf32> to vector<20x1xf32>
    %97 = tpu.reciprocal %96 {approx = true} : vector<20x1xf32> -> vector<20x1xf32>
    %98 = vector.broadcast %97 : vector<20x1xf32> to vector<20x20xf32>
    %99 = arith.mulf %94, %98 : vector<20x20xf32>
    %cst_46 = arith.constant dense<0.000000e+00> : vector<20x8xf32>
    %100 = tpu.matmul %99, %83, %cst_46 {dimension_numbers = #tpu.dot_dimension_numbers<[1], [0], [0], [1], [0, 0, 1, 1], [], []>} : vector<20x20xf32>, vector<20x8xf32>, vector<20x8xf32> -> vector<20x8xf32>
    %101 = vector.extract_strided_slice %82 {offsets = [0, 8], sizes = [20, 8], strides = [1, 1]} : vector<20x16xf32> to vector<20x8xf32>
    %cst_47 = arith.constant dense<0.000000e+00> : vector<20x20xf32>
    %102 = tpu.matmul %101, %101, %cst_47 {dimension_numbers = #tpu.dot_dimension_numbers<[1], [1], [0], [0], [0, 0, 1, 0], [], []>} : vector<20x8xf32>, vector<20x8xf32>, vector<20x20xf32> -> vector<20x20xf32>
    %103 = arith.mulf %102, %77 : vector<20x20xf32>
    %cst_48 = arith.constant 0.000000e+00 : f32
    %104 = vector.broadcast %cst_48 : f32 to vector<20x20xf32>
    %105 = arith.cmpf oeq, %103, %104 : vector<20x20xf32>
    %cst_49 = arith.constant -1.000000e+16 : f32
    %106 = vector.broadcast %cst_49 : f32 to vector<20x20xf32>
    %107 = arith.select %105, %106, %103 : vector<20x20xi1>, vector<20x20xf32>
    %cst_50 = arith.constant dense<0xFF800000> : vector<20xf32>
    %108 = vector.multi_reduction <maximumf>, %107, %cst_50 [1] : vector<20x20xf32> to vector<20xf32>
    %109 = vector.shape_cast %108 : vector<20xf32> to vector<20x1xf32>
    %110 = vector.broadcast %109 : vector<20x1xf32> to vector<20x20xf32>
    %111 = arith.subf %107, %110 : vector<20x20xf32>
    %112 = math.exp %111 : vector<20x20xf32>
    %cst_51 = arith.constant dense<0.000000e+00> : vector<20xf32>
    %113 = vector.multi_reduction <add>, %112, %cst_51 [1] : vector<20x20xf32> to vector<20xf32>
    %114 = vector.shape_cast %113 : vector<20xf32> to vector<20x1xf32>
    %115 = tpu.reciprocal %114 {approx = true} : vector<20x1xf32> -> vector<20x1xf32>
    %116 = vector.broadcast %115 : vector<20x1xf32> to vector<20x20xf32>
    %117 = arith.mulf %112, %116 : vector<20x20xf32>
    %cst_52 = arith.constant dense<0.000000e+00> : vector<20x8xf32>
    %118 = tpu.matmul %117, %101, %cst_52 {dimension_numbers = #tpu.dot_dimension_numbers<[1], [0], [0], [1], [0, 0, 1, 1], [], []>} : vector<20x20xf32>, vector<20x8xf32>, vector<20x8xf32> -> vector<20x8xf32>
    %119 = tpu.concatenate %100, %118 in 1 : vector<20x8xf32>, vector<20x8xf32> -> vector<20x16xf32>
    %120 = vector.broadcast %79 : vector<1x16xf32> to vector<20x16xf32>
    %121 = arith.addf %119, %120 : vector<20x16xf32>
    %cst_53 = arith.constant 0.000000e+00 : f32
    %122 = vector.broadcast %cst_53 : f32 to vector<20x16xf32>
    %123 = arith.cmpf ogt, %121, %122 : vector<20x16xf32>
    %cst_54 = arith.constant 0.00999999977 : f32
    %124 = vector.broadcast %cst_54 : f32 to vector<20x16xf32>
    %125 = arith.mulf %124, %121 : vector<20x16xf32>
    %126 = arith.select %123, %121, %125 : vector<20x16xi1>, vector<20x16xf32>
    %cst_55 = arith.constant dense<0.000000e+00> : vector<20x1xf32>
    %127 = tpu.matmul %126, %80, %cst_55 {dimension_numbers = #tpu.dot_dimension_numbers<[1], [0], [0], [1], [0, 0, 1, 1], [], []>} : vector<20x16xf32>, vector<16x1xf32>, vector<20x1xf32> -> vector<20x1xf32>
    %cst_56 = arith.constant dense<0.000000e+00> : vector<20x20xf32>
    %128 = tpu.matmul %127, %127, %cst_56 {dimension_numbers = #tpu.dot_dimension_numbers<[1], [1], [0], [0], [0, 0, 1, 0], [], []>} : vector<20x1xf32>, vector<20x1xf32>, vector<20x20xf32> -> vector<20x20xf32>
    %129 = arith.mulf %128, %77 : vector<20x20xf32>
    %cst_57 = arith.constant 0.000000e+00 : f32
    %130 = vector.broadcast %cst_57 : f32 to vector<20x20xf32>
    %131 = arith.cmpf oeq, %129, %130 : vector<20x20xf32>
    %cst_58 = arith.constant -1.000000e+16 : f32
    %132 = vector.broadcast %cst_58 : f32 to vector<20x20xf32>
    %133 = arith.select %131, %132, %129 : vector<20x20xi1>, vector<20x20xf32>
    %cst_59 = arith.constant dense<0xFF800000> : vector<20xf32>
    %134 = vector.multi_reduction <maximumf>, %133, %cst_59 [1] : vector<20x20xf32> to vector<20xf32>
    %135 = vector.shape_cast %134 : vector<20xf32> to vector<20x1xf32>
    %136 = vector.broadcast %135 : vector<20x1xf32> to vector<20x20xf32>
    %137 = arith.subf %133, %136 : vector<20x20xf32>
    %138 = math.exp %137 : vector<20x20xf32>
    %cst_60 = arith.constant dense<0.000000e+00> : vector<20xf32>
    %139 = vector.multi_reduction <add>, %138, %cst_60 [1] : vector<20x20xf32> to vector<20xf32>
    %140 = vector.shape_cast %139 : vector<20xf32> to vector<20x1xf32>
    %141 = tpu.reciprocal %140 {approx = true} : vector<20x1xf32> -> vector<20x1xf32>
    %142 = vector.broadcast %141 : vector<20x1xf32> to vector<20x20xf32>
    %143 = arith.mulf %138, %142 : vector<20x20xf32>
    %cst_61 = arith.constant dense<0.000000e+00> : vector<20x1xf32>
    %144 = tpu.matmul %143, %127, %cst_61 {dimension_numbers = #tpu.dot_dimension_numbers<[1], [0], [0], [1], [0, 0, 1, 1], [], []>} : vector<20x20xf32>, vector<20x1xf32>, vector<20x1xf32> -> vector<20x1xf32>
    %145 = vector.broadcast %81 : vector<1x1xf32> to vector<20x1xf32>
    %146 = arith.addf %144, %145 : vector<20x1xf32>
    %cst_62 = arith.constant 0.000000e+00 : f32
    %147 = vector.broadcast %cst_62 : f32 to vector<20x1xf32>
    %148 = arith.cmpf ogt, %146, %147 : vector<20x1xf32>
    %cst_63 = arith.constant 0.00999999977 : f32
    %149 = vector.broadcast %cst_63 : f32 to vector<20x1xf32>
    %150 = arith.mulf %149, %146 : vector<20x1xf32>
    %151 = arith.select %148, %146, %150 : vector<20x1xi1>, vector<20x1xf32>
    %c80 = arith.constant 80 : index
    %c0_64 = arith.constant 0 : index
    %152 = vector.load %arg2[%c80, %c0_64] : memref<120x32xf32, #tpu.memory_space<vmem>>, vector<24x9xf32>
    %c104 = arith.constant 104 : index
    %c0_65 = arith.constant 0 : index
    %153 = vector.load %arg2[%c104, %c0_65] : memref<120x32xf32, #tpu.memory_space<vmem>>, vector<2x24xf32>
    %c64 = arith.constant 64 : index
    %c0_66 = arith.constant 0 : index
    %154 = vector.load %arg3[%c64, %c0_66] : memref<96x20xf32, #tpu.memory_space<vmem>>, vector<20x9xf32>
    %c88 = arith.constant 88 : index
    %c0_67 = arith.constant 0 : index
    %155 = vector.load %arg3[%c88, %c0_67] : memref<96x20xf32, #tpu.memory_space<vmem>>, vector<2x20xf32>
    %c112 = arith.constant 112 : index
    %c0_68 = arith.constant 0 : index
    %156 = vector.load %arg2[%c112, %c0_68] : memref<120x32xf32, #tpu.memory_space<vmem>>, vector<1x9xf32>
    %157 = vector.broadcast %75 : vector<24x1xf32> to vector<24x9xf32>
    %158 = arith.mulf %157, %152 : vector<24x9xf32>
    %cst_69 = arith.constant dense<0.000000e+00> : vector<2x9xf32>
    %159 = tpu.matmul %153, %158, %cst_69 {dimension_numbers = #tpu.dot_dimension_numbers<[1], [0], [0], [1], [0, 0, 1, 1], [], []>} : vector<2x24xf32>, vector<24x9xf32>, vector<2x9xf32> -> vector<2x9xf32>
    %160 = vector.broadcast %151 : vector<20x1xf32> to vector<20x9xf32>
    %161 = arith.mulf %160, %154 : vector<20x9xf32>
    %cst_70 = arith.constant dense<0.000000e+00> : vector<2x9xf32>
    %162 = tpu.matmul %155, %161, %cst_70 {dimension_numbers = #tpu.dot_dimension_numbers<[1], [0], [0], [1], [0, 0, 1, 1], [], []>} : vector<2x20xf32>, vector<20x9xf32>, vector<2x9xf32> -> vector<2x9xf32>
    %163 = arith.addf %159, %162 : vector<2x9xf32>
    %164 = vector.broadcast %156 : vector<1x9xf32> to vector<2x9xf32>
    %165 = arith.addf %163, %164 : vector<2x9xf32>
    %c0_71 = arith.constant 0 : index
    %c0_72 = arith.constant 0 : index
    %166 = vector.load %arg4[%c0_71, %c0_72] : memref<2x9xf32, #tpu.memory_space<vmem>>, vector<2x9xf32>
    tpu.vector_store %arg4[%c0_71, %c0_72], %165 {strides = array<i32>} : memref<2x9xf32, #tpu.memory_space<vmem>>, vector<2x9xf32>,
    return
  }
}

</mosaic_0001>

<bundles_post_ra>
// kernel: gatnet_forward.1
= control target key start
LH: loop header
LB: loop body
LE: loop exit
PB: predicated region body
PF: predicated region fallthrough
CT: control target
= control target key end

     0   :  { %vm41_vm0 = vcmask 1045504   ;;  %vm31_vm1 = vcmask 48128   ;;  %s1544_s0 = inlined_call_operand.vmem [shape: f32[24,6], index: 0, kind: input, shape index: {}]   ;;  %s1545_s1 = inlined_call_operand.vmem [shape: f32[20,1], index: 1, kind: input, shape index: {}]   ;;  %s1546_s2 = inlined_call_operand.vmem [shape: f32[120,32], index: 2, kind: input, shape index: {}]   ;;  %s1547_s3 = inlined_call_operand.vmem [shape: f32[96,20], index: 3, kind: input, shape index: {}]   ;;  %s1548_s4 = inlined_call_operand.hbm [shape: f32[2,9], index: 4, kind: output, shape index: {}]  }
   0x1   :  { %v24_v0 = vld [vmem:[%s1546_s2] sm:$0x3f] }
   0x2   :  { %v18_v1 = vld [vmem:[%s1544_s0] sm:$0xff]  ;;  %1078 = vmatpush.msk.msra.mxu0 %vm41_vm0, %v24_v0 }
   0x3   :  { %1079 = vmatmul.msk.f32.vlgmr.msra.gmra.mxu0 %vm31_vm1, %v18_v1 }
   0x4   :  { %9 = vsyncpa [#allocation3], 0  ;;  %v19_v2 = vld [vmem:[%s1544_s0 + $0x8] sm:$0xff]  ;;  %v20_v3 = vld [vmem:[%s1544_s0 + $0x10] sm:$0xff]  ;;  %s1264_s23 = smov 112   ;;  %vm71_vm2 = vcmask 130048  }
   0x5   :  { %v1320_v10 = vld [vmem:[%s1546_s2 + $0x38] sm:$0xff]  ;;  %vm116_vm3 = vcmask 195584   ;;  %v1331_v22 = vld [vmem:[%s1546_s2 + $0x40] sm:$0xff]  ;;  %v1339_v30 = vld [vmem:[%s1546_s2 + $0x48] sm:$0xff]  ;;  %s1265_s29 = smov 16   ;;  %vm331_vm11 = vcmask 261120  }
   0x6   :  { %vm510_vm14 = vcmask 1040384   ;;  %vm367_vm15 = vcmask 7168   ;;  %s1267_s27 = smov 8   ;;  %s1269_s28 = smov [#allocation2]  }
   0x7   :  { %s1069_s6 = sshll.u32 %s1548_s4, 4  ;;  %s1070_s6 = int_to_ptr.hbm [resolvable:$true] %s1069_s6 }
   0xb   :  { %1080 = vmatmul.msk.f32.gmra.mxu0 %vm31_vm1, %v19_v2 }
  0x13   :  { %1081 = vmatmul.msk.f32.gmra.mxu0 %vm31_vm1, %v20_v3 }
  0x80   :  { %v62_v4 = vpop.f32.mrf.mxu0 }
  0x81   :  { %185 = vrot.lane.b32.xlu1 %v62_v4, %s1264_s23 }
  0x88   :  { %v65_v5 = vpop.f32.mrf.mxu0 }
  0x90   :  { %v68_v6 = vpop.f32.mrf.mxu0 }
  0x91   :  { %189 = vrot.lane.b32.xlu0 %v68_v6, %s1264_s23  ;;  %1082 = vmatpush.xpose.msk.msra.mxu1 %vm71_vm2, %v68_v6 }
  0x92   :  { %172 = vmatpush.msra.mxu2 %v68_v6 }
  0x94   :  { %173 = vmatpush.msra.mxu2 %v65_v5 }
  0x95   :  { %1083 = vmatpush.xpose.msk.msra.mxu1 %vm71_vm2, %v65_v5 }
  0x96   :  { %174 = vmatpush.msra.mxu2 %v62_v4 }
  0x99   :  { %187 = vrot.lane.b32.xlu0 %v65_v5, %s1264_s23  ;;  %1084 = vmatpush.xpose.msk.msra.mxu1 %vm71_vm2, %v62_v4 }
  0x9c   :  { %1085 = vmatmul.msk.f32.vlgmr.msra.gmra.mxu1 %vm71_vm2, %v62_v4 }
  0xa4   :  { %1086 = vmatmul.msk.f32.gmra.mxu1 %vm71_vm2, %v65_v5 }
  0xac   :  { %1087 = vmatmul.msk.f32.gmra.mxu1 %vm71_vm2, %v68_v6 }
  0xf3   :  { %v186_v9 = vpop.permute.xlu1 %185 }
 0x103   :  { %v190_v7 = vpop.permute.xlu0 %189 }
 0x104   :  { %1091 = vmatpush.xpose.msk.msra.mxu3 %vm71_vm2, %v190_v7  ;;  %290 = vmatpush.msrb.mxu0 %v190_v7 }
 0x10b   :  { %v188_v8 = vpop.permute.xlu0 %187 }
 0x10c   :  { %1092 = vmatpush.xpose.msk.msra.mxu3 %vm71_vm2, %v188_v8  ;;  %291 = vmatpush.msrb.mxu0 %v188_v8 }
 0x10e   :  { %292 = vmatpush.msrb.mxu0 %v186_v9 }
 0x110   :  { %1093 = vmatpush.xpose.msk.msra.mxu3 %vm71_vm2, %v186_v9 }
 0x113   :  { %1094 = vmatmul.msk.f32.vlgmr.msra.gmra.mxu3 %vm71_vm2, %v186_v9 }
 0x119   :  { %v98_v11 = vpop.f32.mrf.mxu1 }
 0x11a   :  { %v107_v12 = vmul.f32 %v98_v11, %v1320_v10 }
 0x11b   :  { %1095 = vmatmul.msk.f32.gmra.mxu3 %vm71_vm2, %v188_v8 }
 0x11c   :  { %vm110_vm4 = vcmp.eq.f32.partialorder %v107_v12, 0.0 }
 0x11d   :  { %v113_v13 = vsel %vm110_vm4, -1e+16, %v107_v12 }
 0x11e   :  { %v117_v14 = vsel %vm116_vm3, %v113_v13, -inf }
 0x11f   :  { %118 = vmax.xlane.f32.xlu0 %v117_v14 }
 0x121   :  { %v101_v29 = vpop.f32.mrf.mxu1 }
 0x122   :  { %v108_v33 = vmul.f32 %v101_v29, %v1331_v22  ;;  %v26_v29 = vld [vmem:[%s1546_s2 + $0x10] sm:$0xff] }
 0x123   :  { %1096 = vmatmul.msk.f32.gmra.mxu3 %vm71_vm2, %v190_v7 }
 0x124   :  { %vm111_vm8 = vcmp.eq.f32.partialorder %v108_v33, 0.0 }
 0x125   :  { %v114_v37 = vsel %vm111_vm8, -1e+16, %v108_v33  ;;  %vm585_vm8 = vcmask 162816  }
 0x126   :  { %v120_v39 = vsel %vm116_vm3, %v114_v37, -inf }
 0x129   :  { %v104_v36 = vpop.f32.mrf.mxu1 }
 0x12a   :  { %v109_v38 = vmul.f32 %v104_v36, %v1339_v30 }
 0x12c   :  { %vm112_vm9 = vcmp.eq.f32.partialorder %v109_v38, 0.0 }
 0x12d   :  { %v115_v40 = vsel %vm112_vm9, -1e+16, %v109_v38 }
 0x12e   :  { %v123_v41 = vsel %vm116_vm3, %v115_v40, -inf }
 0x192   :  { %v119_v15 = vpop.xlane.xlu0 %118 }
 0x193   :  { %v126_v16 = vsub.f32 %v113_v13, %v119_v15 }
 0x195   :  { %v129_v17 = vmul.f32 1.442695, %v126_v16 }
 0x196   :  { %v214_v18 = vpop.f32.mrf.mxu3 }
 0x197   :  { %v223_v19 = vmul.f32 %v214_v18, %v1320_v10  ;;  %1166 = vpow2.f32 %v129_v17 }
 0x199   :  { %vm226_vm5 = vcmp.eq.f32.partialorder %v223_v19, 0.0 }
 0x19a   :  { %v229_v20 = vsel %vm226_vm5, -1e+16, %v223_v19  ;;  %vm540_vm5 = vcmask 64512  }
 0x19b   :  { %v232_v21 = vsel %vm116_vm3, %v229_v20, -inf }
 0x19c   :  { %233 = vmax.xlane.f32.xlu1 %v232_v21 }
 0x19d   :  { %v1167_v25 = vpop.eup %1166 }
 0x19e   :  { %v217_v23 = vpop.f32.mrf.mxu3  ;;  %v135_v28 = vsel %vm116_vm3, %v1167_v25, 0.0 }
 0x19f   :  { %v224_v24 = vmul.f32 %v217_v23, %v1331_v22 }
 0x1a1   :  { %vm227_vm6 = vcmp.eq.f32.partialorder %v224_v24, 0.0 }
 0x1a2   :  { %v230_v26 = vsel %vm227_vm6, -1e+16, %v224_v24  ;;  %vm629_vm6 = vcmask 1043456  }
 0x1a3   :  { %v235_v27 = vsel %vm116_vm3, %v230_v26, -inf }
 0x1a4   :  { %236 = vmax.xlane.f32.xlu2 %v235_v27  ;;  %136 = vadd.xlane.f32.xlu1 %v135_v28  ;;  %v28_v27 = vld [vmem:[%s1546_s2 + $0x20] sm:$0xff]  ;;  %v27_v28 = vld [vmem:[%s1546_s2 + $0x18] sm:$0xff] }
 0x1a6   :  { %v220_v31 = vpop.f32.mrf.mxu3 }
 0x1a7   :  { %v225_v32 = vmul.f32 %v220_v31, %v1339_v30 }
 0x1a9   :  { %vm228_vm7 = vcmp.eq.f32.partialorder %v225_v32, 0.0 }
 0x1aa   :  { %v231_v34 = vsel %vm228_vm7, -1e+16, %v225_v32  ;;  %v1161_v32 = vld [vmem:[%s1546_s2 + $0x8] ss:$0 sm:$0xff] }
 0x1ab   :  { %v238_v35 = vsel %vm116_vm3, %v231_v34, -inf }
 0x1ac   :  { %239 = vmax.xlane.f32.xlu2 %v238_v35 }
 0x1b4   :  { %121 = vmax.xlane.f32.xlu2 %v120_v39 }
 0x1bc   :  { %124 = vmax.xlane.f32.xlu2 %v123_v41 }
 0x20f   :  { %v234_v42 = vpop.xlane.xlu1 %233 }
 0x210   :  { %v241_v43 = vsub.f32 %v229_v20, %v234_v42 }
 0x212   :  { %v244_v44 = vmul.f32 1.442695, %v241_v43 }
 0x214   :  { %1168 = vpow2.f32 %v244_v44 }
 0x217   :  { %v237_v45 = vpop.xlane.xlu2 %236  ;;  %v137_v46 = vpop.xlane.xlu1 %136 }
 0x218   :  { %v242_v47 = vsub.f32 %v230_v26, %v237_v45  ;;  %1170 = vrcp.f32 %v137_v46  ;;  %v29_v26 = vld [vmem:[%s1546_s2 + $0x28] sm:$0xff] }
 0x219   :  { %353 = vmatpush.msrb.mxu2 %v29_v26 }
 0x21a   :  { %v1169_v48 = vpop.eup %1168  ;;  %v246_v49 = vmul.f32 1.442695, %v242_v47 }
 0x21b   :  { %v250_v50 = vsel %vm116_vm3, %v1169_v48, 0.0  ;;  %354 = vmatpush.msrb.mxu2 %v28_v27 }
 0x21c   :  { %1172 = vpow2.f32 %v246_v49  ;;  %251 = vadd.xlane.f32.xlu2 %v250_v50 }
 0x21d   :  { %355 = vmatpush.msrb.mxu2 %v27_v28 }
 0x21e   :  { %v1171_v51 = vpop.eup %1170 }
 0x21f   :  { %v240_v52 = vpop.xlane.xlu2 %239  ;;  %v147_v53 = vmul.f32 %v1171_v51, %v1167_v25  ;;  %356 = vmatpush.msrb.mxu2 %v26_v29 }
 0x220   :  { %v243_v54 = vsub.f32 %v231_v34, %v240_v52  ;;  %v496_v52 = vld [vmem:[%s1547_s3] sm:$0x1] }
 0x221   :  { %1088 = vmatmul.msk.f32.vlgmr.msra.gmra.mxu2 %vm116_vm3, %v147_v53  ;;  %v490_v53 = vld [vmem:[%s1545_s1] sm:$0xff]  ;;  %1112 = vmatpush.msk.msra.mxu0 %vm510_vm14, %v496_v52 }
 0x222   :  { %v1173_v55 = vpop.eup %1172  ;;  %v248_v56 = vmul.f32 1.442695, %v243_v54 }
 0x223   :  { %v253_v57 = vsel %vm116_vm3, %v1173_v55, 0.0 }
 0x224   :  { %1174 = vpow2.f32 %v248_v56  ;;  %254 = vadd.xlane.f32.xlu2 %v253_v57  ;;  %v492_v56 = vld [vmem:[%s1545_s1 + $0x10] sm:$0xf] }
 0x227   :  { %v122_v58 = vpop.xlane.xlu2 %121 }
 0x228   :  { %v127_v59 = vsub.f32 %v114_v37, %v122_v58 }
 0x22a   :  { %v1175_v60 = vpop.eup %1174  ;;  %v131_v61 = vmul.f32 1.442695, %v127_v59 }
 0x22b   :  { %v256_v62 = vsel %vm116_vm3, %v1175_v60, 0.0 }
 0x22c   :  { %1176 = vpow2.f32 %v131_v61  ;;  %257 = vadd.xlane.f32.xlu2 %v256_v62 }
 0x22f   :  { %v125_v63 = vpop.xlane.xlu2 %124 }
 0x230   :  { %v128_v0 = vsub.f32 %v115_v40, %v125_v63 }
 0x232   :  { %v1177_v1 = vpop.eup %1176  ;;  %v133_v2 = vmul.f32 1.442695, %v128_v0 }
 0x233   :  { %v138_v3 = vsel %vm116_vm3, %v1177_v1, 0.0 }
 0x234   :  { %1178 = vpow2.f32 %v133_v2  ;;  %139 = vadd.xlane.f32.xlu2 %v138_v3 }
 0x23a   :  { %v1179_v4 = vpop.eup %1178 }
 0x23b   :  { %v141_v5 = vsel %vm116_vm3, %v1179_v4, 0.0 }
 0x23c   :  { %142 = vadd.xlane.f32.xlu0 %v141_v5 }
 0x28f   :  { %v252_v6 = vpop.xlane.xlu2 %251 }
 0x290   :  { %1180 = vrcp.f32 %v252_v6 }
 0x296   :  { %v1181_v7 = vpop.eup %1180 }
 0x297   :  { %v255_v8 = vpop.xlane.xlu2 %254  ;;  %v262_v9 = vmul.f32 %v1181_v7, %v1169_v48 }
 0x298   :  { %1182 = vrcp.f32 %v255_v8 }
 0x299   :  { %1097 = vmatmul.msk.f32.vlgmr.msrb.gmra.mxu0 %vm116_vm3, %v262_v9 }
 0x29e   :  { %v1183_v11 = vpop.eup %1182 }
 0x29f   :  { %v258_v12 = vpop.xlane.xlu2 %257  ;;  %v263_v13 = vmul.f32 %v1183_v11, %v1173_v55  ;;  %v491_v55 = vld [vmem:[%s1545_s1 + $0x8] sm:$0xff]  ;;  %s1266_s1 = smov 120  }
 0x2a0   :  { %1184 = vrcp.f32 %v258_v12 }
 0x2a1   :  { %1098 = vmatmul.msk.f32.gmra.mxu0 %vm116_vm3, %v263_v13 }
 0x2a4   :  { %v176_v31 = vpop.f32.mrf.mxu2 }
 0x2a6   :  { %v1185_v14 = vpop.eup %1184 }
 0x2a7   :  { %v140_v15 = vpop.xlane.xlu2 %139  ;;  %v264_v16 = vmul.f32 %v1185_v14, %v1175_v60 }
 0x2a8   :  { %1186 = vrcp.f32 %v140_v15 }
 0x2a9   :  { %1099 = vmatmul.msk.f32.gmra.mxu0 %vm116_vm3, %v264_v16 }
 0x2ae   :  { %v1187_v17 = vpop.eup %1186 }
 0x2af   :  { %v143_v18 = vpop.xlane.xlu0 %142  ;;  %v148_v19 = vmul.f32 %v1187_v17, %v1177_v1 }
 0x2b0   :  { %1188 = vrcp.f32 %v143_v18 }
 0x2b1   :  { %1089 = vmatmul.msk.f32.gmra.mxu2 %vm116_vm3, %v148_v19  ;;  %1113 = vmatmul.msk.f32.vlgmr.msra.gmra.mxu0 %vm367_vm15, %v490_v53 }
 0x2b6   :  { %v1189_v20 = vpop.eup %1188 }
 0x2b7   :  { %v149_v21 = vmul.f32 %v1189_v20, %v1179_v4 }
 0x2b9   :  { %1090 = vmatmul.msk.f32.gmra.mxu2 %vm116_vm3, %v149_v21  ;;  %1114 = vmatmul.msk.f32.gmra.mxu0 %vm367_vm15, %v491_v55 }
 0x2c1   :  { %1115 = vmatmul.msk.f32.gmra.mxu0 %vm367_vm15, %v492_v56 }
 0x316   :  { %v294_v23 = vpop.f32.mrf.mxu0 }
 0x317   :  { %306 = vrot.lane.b32.xlu1 %v294_v23, %s1265_s29 }
 0x31e   :  { %v297_v24 = vpop.f32.mrf.mxu0 }
 0x31f   :  { %308 = vrot.lane.b32.xlu2 %v297_v24, %s1265_s29 }
 0x326   :  { %v300_v25 = vpop.f32.mrf.mxu0 }
 0x327   :  { %310 = vrot.lane.b32.xlu0 %v300_v25, %s1265_s29  ;;  %s1067_s29 = sshll.u32 %s1269_s28, 4  ;;  %s1068_s29 = int_to_ptr.vmem [resolvable:$true] %s1067_s29 }
 0x32e   :  { %v531_v4 = vpop.f32.mrf.mxu0 }
 0x334   :  { %v179_v36 = vpop.f32.mrf.mxu2 }
 0x336   :  { %v534_v5 = vpop.f32.mrf.mxu0 }
 0x33c   :  { %v182_v44 = vpop.f32.mrf.mxu2 }
 0x33e   :  { %v537_v6 = vpop.f32.mrf.mxu0 }
 0x33f   :  { %1116 = vmatpush.xpose.msk.msra.mxu2 %vm540_vm5, %v537_v6 }
 0x343   :  { %1117 = vmatpush.xpose.msk.msra.mxu2 %vm540_vm5, %v534_v5 }
 0x347   :  { %1118 = vmatpush.xpose.msk.msra.mxu2 %vm540_vm5, %v531_v4 }
 0x379   :  { %v309_v33 = vpop.permute.xlu2 %308 }
 0x37a   :  { %v316_v38 = vsel %vm71_vm2, %v179_v36, %v309_v33 }
 0x37b   :  { %v320_v40 = vadd.f32 %v1161_v32, %v316_v38 }
 0x37d   :  { %v326_v42 = vmul.f32 0.01, %v320_v40  ;;  %vm323_vm12 = vcmp.gt.f32.partialorder %v320_v40, 0.0 }
 0x37f   :  { %v329_v43 = vsel %vm323_vm12, %v320_v40, %v326_v42  ;;  %v1432_v40 = vld [vmem:[%s1547_s3 + $0x28] sm:$0xff] }
 0x389   :  { %v307_v34 = vpop.permute.xlu1 %306 }
 0x38a   :  { %v315_v35 = vsel %vm71_vm2, %v176_v31, %v307_v34 }
 0x38b   :  { %v319_v37 = vadd.f32 %v1161_v32, %v315_v35 }
 0x38d   :  { %v325_v39 = vmul.f32 0.01, %v319_v37  ;;  %vm322_vm10 = vcmp.gt.f32.partialorder %v319_v37, 0.0 }
 0x38f   :  { %v328_v41 = vsel %vm322_vm10, %v319_v37, %v325_v39 }
 0x390   :  { %1100 = vmatmul.msk.f32.vlgmr.msrb.gmra.mxu2 %vm331_vm11, %v328_v41 }
 0x398   :  { %1101 = vmatmul.msk.f32.gmra.mxu2 %vm331_vm11, %v329_v43 }
 0x399   :  { %v311_v45 = vpop.permute.xlu0 %310 }
 0x39a   :  { %v317_v46 = vsel %vm71_vm2, %v182_v44, %v311_v45 }
 0x39b   :  { %v321_v47 = vadd.f32 %v1161_v32, %v317_v46  ;;  %v1440_v46 = vld [vmem:[%s1547_s3 + $0x30] sm:$0xff] }
 0x39d   :  { %vm324_vm13 = vcmp.gt.f32.partialorder %v321_v47, 0.0  ;;  %v327_v48 = vmul.f32 0.01, %v321_v47 }
 0x39f   :  { %v330_v49 = vsel %vm324_vm13, %v321_v47, %v327_v48  ;;  %v1445_v47 = vld [vmem:[%s1547_s3 + $0x38] sm:$0xf]  ;;  %vm592_vm13 = vcmask 158720  }
 0x3a0   :  { %1102 = vmatmul.msk.f32.gmra.mxu2 %vm331_vm11, %v330_v49 }
 0x3a8   :  { %1119 = vmatmul.msk.f32.vlgmr.msra.gmra.mxu2 %vm540_vm5, %v531_v4 }
 0x3b0   :  { %1120 = vmatmul.msk.f32.gmra.mxu2 %vm540_vm5, %v534_v5 }
 0x3b8   :  { %1121 = vmatmul.msk.f32.gmra.mxu2 %vm540_vm5, %v537_v6 }
 0x413   :  { %v358_v50 = vpop.f32.mrf.mxu2 }
 0x41b   :  { %v361_v51 = vpop.f32.mrf.mxu2 }
 0x423   :  { %v364_v54 = vpop.f32.mrf.mxu2 }
 0x424   :  { %1103 = vmatpush.xpose.msk.msrb.mxu1 %vm367_vm15, %v364_v54  ;;  %468 = vmatpush.msrb.mxu3 %v364_v54 }
 0x426   :  { %469 = vmatpush.msrb.mxu3 %v361_v51 }
 0x428   :  { %1104 = vmatpush.xpose.msk.msrb.mxu1 %vm367_vm15, %v361_v51  ;;  %470 = vmatpush.msrb.mxu3 %v358_v50 }
 0x42b   :  { %v567_v37 = vpop.f32.mrf.mxu2 }
 0x42c   :  { %1105 = vmatpush.xpose.msk.msrb.mxu1 %vm367_vm15, %v358_v50  ;;  %v576_v43 = vmul.f32 %v567_v37, %v1432_v40 }
 0x42e   :  { %vm579_vm9 = vcmp.eq.f32.partialorder %v576_v43, 0.0 }
 0x42f   :  { %1106 = vmatmul.msk.f32.vlgmr.msrb.gmra.mxu1 %vm367_vm15, %v358_v50 }
 0x430   :  { %1122 = vmatpush.msk.msra.mxu1 %vm629_vm6, %v537_v6 }
 0x432   :  { %646 = vmatpush.msra.mxu1 %v534_v5 }
 0x433   :  { %v570_v39 = vpop.f32.mrf.mxu2 }
 0x434   :  { %647 = vmatpush.msra.mxu1 %v531_v4  ;;  %v577_v52 = vmul.f32 %v570_v39, %v1440_v46 }
 0x436   :  { %vm580_vm12 = vcmp.eq.f32.partialorder %v577_v52, 0.0 }
 0x437   :  { %1107 = vmatmul.msk.f32.gmra.mxu1 %vm367_vm15, %v361_v51  ;;  %v582_v51 = vsel %vm579_vm9, -1e+16, %v576_v43 }
 0x438   :  { %v586_v55 = vsel %vm585_vm8, %v582_v51, -inf }
 0x43b   :  { %v573_v48 = vpop.f32.mrf.mxu2 }
 0x43c   :  { %v578_v53 = vmul.f32 %v573_v48, %v1445_v47 }
 0x43e   :  { %vm581_vm11 = vcmp.eq.f32.partialorder %v578_v53, 0.0 }
 0x43f   :  { %1108 = vmatmul.msk.f32.gmra.mxu1 %vm367_vm15, %v364_v54 }
 0x4ac   :  { %v394_v57 = vpop.f32.mrf.mxu1 }
 0x4ad   :  { %v403_v58 = vmul.f32 %v394_v57, %v1320_v10 }
 0x4af   :  { %vm406_vm0 = vcmp.eq.f32.partialorder %v403_v58, 0.0 }
 0x4b0   :  { %v409_v59 = vsel %vm406_vm0, -1e+16, %v403_v58 }
 0x4b1   :  { %v412_v60 = vsel %vm116_vm3, %v409_v59, -inf }
 0x4b2   :  { %413 = vmax.xlane.f32.xlu1 %v412_v60  ;;  %v583_v60 = vsel %vm580_vm12, -1e+16, %v577_v52 }
 0x4b4   :  { %v397_v61 = vpop.f32.mrf.mxu1 }
 0x4b5   :  { %v404_v62 = vmul.f32 %v397_v61, %v1331_v22 }
 0x4b7   :  { %vm407_vm1 = vcmp.eq.f32.partialorder %v404_v62, 0.0 }
 0x4b8   :  { %v410_v63 = vsel %vm407_vm1, -1e+16, %v404_v62 }
 0x4b9   :  { %v415_v0 = vsel %vm116_vm3, %v410_v63, -inf }
 0x4ba   :  { %416 = vmax.xlane.f32.xlu0 %v415_v0 }
 0x4bc   :  { %v400_v1 = vpop.f32.mrf.mxu1 }
 0x4bd   :  { %v405_v2 = vmul.f32 %v400_v1, %v1339_v30 }
 0x4bf   :  { %vm408_vm4 = vcmp.eq.f32.partialorder %v405_v2, 0.0 }
 0x4c0   :  { %v411_v3 = vsel %vm408_vm4, -1e+16, %v405_v2 }
 0x4c1   :  { %v418_v10 = vsel %vm116_vm3, %v411_v3, -inf }
 0x4c2   :  { %419 = vmax.xlane.f32.xlu2 %v418_v10 }
 0x525   :  { %v414_v22 = vpop.xlane.xlu1 %413 }
 0x526   :  { %v421_v30 = vsub.f32 %v409_v59, %v414_v22  ;;  %v584_v59 = vsel %vm581_vm11, -1e+16, %v578_v53 }
 0x527   :  { %v593_v62 = vsel %vm592_vm13, %v584_v59, -inf }
 0x528   :  { %v424_v7 = vmul.f32 1.442695, %v421_v30 }
 0x52a   :  { %1190 = vpow2.f32 %v424_v7 }
 0x52d   :  { %v417_v8 = vpop.xlane.xlu0 %416 }
 0x52e   :  { %v422_v9 = vsub.f32 %v410_v63, %v417_v8  ;;  %v589_v63 = vsel %vm585_vm8, %v583_v60, -inf }
 0x530   :  { %v1191_v11 = vpop.eup %1190  ;;  %v426_v12 = vmul.f32 1.442695, %v422_v9 }
 0x531   :  { %v430_v13 = vsel %vm116_vm3, %v1191_v11, 0.0 }
 0x532   :  { %1192 = vpow2.f32 %v426_v12  ;;  %431 = vadd.xlane.f32.xlu1 %v430_v13 }
 0x535   :  { %v420_v14 = vpop.xlane.xlu2 %419 }
 0x536   :  { %v423_v15 = vsub.f32 %v411_v3, %v420_v14 }
 0x538   :  { %v1193_v16 = vpop.eup %1192  ;;  %v428_v17 = vmul.f32 1.442695, %v423_v15 }
 0x539   :  { %v433_v18 = vsel %vm116_vm3, %v1193_v16, 0.0 }
 0x53a   :  { %1194 = vpow2.f32 %v428_v17  ;;  %434 = vadd.xlane.f32.xlu0 %v433_v18 }
 0x540   :  { %v1195_v19 = vpop.eup %1194 }
 0x541   :  { %v436_v20 = vsel %vm116_vm3, %v1195_v19, 0.0 }
 0x542   :  { %437 = vadd.xlane.f32.xlu2 %v436_v20 }
 0x54b   :  { %662 = vrot.lane.b32.xlu1 %v537_v6, %s1266_s1 }
 0x54e   :  { %660 = vrot.lane.b32.xlu0 %v534_v5, %s1266_s1 }
 0x55a   :  { %658 = vrot.lane.b32.xlu2 %v531_v4, %s1266_s1 }
 0x5a5   :  { %v432_v21 = vpop.xlane.xlu1 %431 }
 0x5a6   :  { %1196 = vrcp.f32 %v432_v21 }
 0x5ac   :  { %v1197_v23 = vpop.eup %1196 }
 0x5ad   :  { %v435_v24 = vpop.xlane.xlu0 %434  ;;  %v442_v25 = vmul.f32 %v1197_v23, %v1191_v11 }
 0x5ae   :  { %1198 = vrcp.f32 %v435_v24 }
 0x5af   :  { %1109 = vmatmul.msk.f32.vlgmr.msrb.gmra.mxu3 %vm116_vm3, %v442_v25 }
 0x5b4   :  { %v1199_v26 = vpop.eup %1198 }
 0x5b5   :  { %v438_v27 = vpop.xlane.xlu2 %437  ;;  %v443_v28 = vmul.f32 %v1199_v26, %v1193_v16 }
 0x5b6   :  { %1200 = vrcp.f32 %v438_v27 }
 0x5b7   :  { %1110 = vmatmul.msk.f32.gmra.mxu3 %vm116_vm3, %v443_v28 }
 0x5bc   :  { %v1201_v29 = vpop.eup %1200 }
 0x5bd   :  { %v663_v31 = vpop.permute.xlu1 %662  ;;  %v444_v32 = vmul.f32 %v1201_v29, %v1195_v19  ;;  %v659_v34 = vpop.permute.xlu2 %658 }
 0x5be   :  { %1126 = vmatpush.xpose.msk.msra.mxu3 %vm540_vm5, %v663_v31  ;;  %1132 = vmatpush.msk.msrb.mxu0 %vm629_vm6, %v663_v31 }
 0x5bf   :  { %1111 = vmatmul.msk.f32.gmra.mxu3 %vm116_vm3, %v444_v32 }
 0x5c0   :  { %v661_v33 = vpop.permute.xlu0 %660 }
 0x5c1   :  { %765 = vmatpush.msrb.mxu0 %v661_v33 }
 0x5c2   :  { %1127 = vmatpush.xpose.msk.msra.mxu3 %vm540_vm5, %v661_v33 }
 0x5c3   :  { %766 = vmatpush.msrb.mxu0 %v659_v34 }
 0x5c6   :  { %1128 = vmatpush.xpose.msk.msra.mxu3 %vm540_vm5, %v659_v34 }
 0x5c9   :  { %1129 = vmatmul.msk.f32.vlgmr.msra.gmra.mxu3 %vm540_vm5, %v659_v34 }
 0x5d1   :  { %1130 = vmatmul.msk.f32.gmra.mxu3 %vm540_vm5, %v661_v33 }
 0x5d9   :  { %1131 = vmatmul.msk.f32.gmra.mxu3 %vm540_vm5, %v663_v31 }
 0x632   :  { %v1423_v35 = vpop.f32.mrf.mxu3 }
 0x63a   :  { %v1425_v36 = vpop.f32.mrf.mxu3 }
 0x642   :  { %v1427_v38 = vpop.f32.mrf.mxu3 }
 0x64c   :  { %v687_v41 = vpop.f32.mrf.mxu3 }
 0x64d   :  { %v696_v42 = vmul.f32 %v687_v41, %v1432_v40 }
 0x64f   :  { %vm699_vm7 = vcmp.eq.f32.partialorder %v696_v42, 0.0 }
 0x650   :  { %v702_v44 = vsel %vm699_vm7, -1e+16, %v696_v42 }
 0x651   :  { %v705_v45 = vsel %vm585_vm8, %v702_v44, -inf }
 0x652   :  { %706 = vmax.xlane.f32.xlu0 %v705_v45 }
 0x654   :  { %v690_v49 = vpop.f32.mrf.mxu3 }
 0x655   :  { %v697_v50 = vmul.f32 %v690_v49, %v1440_v46 }
 0x657   :  { %vm700_vm10 = vcmp.eq.f32.partialorder %v697_v50, 0.0 }
 0x658   :  { %v703_v54 = vsel %vm700_vm10, -1e+16, %v697_v50 }
 0x659   :  { %v708_v56 = vsel %vm585_vm8, %v703_v54, -inf }
 0x65a   :  { %587 = vmax.xlane.f32.xlu0 %v586_v55  ;;  %709 = vmax.xlane.f32.xlu1 %v708_v56 }
 0x65c   :  { %v693_v57 = vpop.f32.mrf.mxu3 }
 0x65d   :  { %v698_v58 = vmul.f32 %v693_v57, %v1445_v47 }
 0x65f   :  { %vm701_vm14 = vcmp.eq.f32.partialorder %v698_v58, 0.0 }
 0x660   :  { %v704_v61 = vsel %vm701_vm14, -1e+16, %v698_v58  ;;  %v499_v58 = vld [vmem:[%s1547_s3 + $0x18] sm:$0xff] }
 0x661   :  { %v711_v0 = vsel %vm592_vm13, %v704_v61, -inf  ;;  %828 = vmatpush.msrb.mxu2 %v499_v58 }
 0x662   :  { %594 = vmax.xlane.f32.xlu0 %v593_v62  ;;  %590 = vmax.xlane.f32.xlu1 %v589_v63 }
 0x663   :  { %712 = vmax.xlane.f32.xlu2 %v711_v0 }
 0x6c5   :  { %v707_v1 = vpop.xlane.xlu0 %706 }
 0x6c6   :  { %v714_v2 = vsub.f32 %v702_v44, %v707_v1 }
 0x6c8   :  { %v717_v3 = vmul.f32 1.442695, %v714_v2 }
 0x6ca   :  { %1202 = vpow2.f32 %v717_v3 }
 0x6cd   :  { %v588_v10 = vpop.xlane.xlu0 %587  ;;  %v710_v4 = vpop.xlane.xlu1 %709 }
 0x6ce   :  { %v596_v5 = vsub.f32 %v582_v51, %v588_v10  ;;  %v715_v6 = vsub.f32 %v703_v54, %v710_v4 }
 0x6d0   :  { %v1203_v22 = vpop.eup %1202  ;;  %v599_v30 = vmul.f32 1.442695, %v596_v5  ;;  %v719_v7 = vmul.f32 1.442695, %v715_v6 }
 0x6d1   :  { %v723_v8 = vsel %vm585_vm8, %v1203_v22, 0.0 }
 0x6d2   :  { %1204 = vpow2.f32 %v599_v30  ;;  %724 = vadd.xlane.f32.xlu2 %v723_v8 }
 0x6d3   :  { %1206 = vpow2.f32 %v719_v7 }
 0x6d5   :  { %v591_v9 = vpop.xlane.xlu1 %590  ;;  %v595_v13 = vpop.xlane.xlu0 %594 }
 0x6d6   :  { %v597_v11 = vsub.f32 %v583_v60, %v591_v9  ;;  %v713_v12 = vpop.xlane.xlu2 %712  ;;  %v598_v20 = vsub.f32 %v584_v59, %v595_v13  ;;  %v498_v59 = vld [vmem:[%s1547_s3 + $0x10] sm:$0xff] }
 0x6d7   :  { %v716_v14 = vsub.f32 %v704_v61, %v713_v12  ;;  %829 = vmatpush.msrb.mxu2 %v498_v59  ;;  %v1163_v61 = vld [vmem:[%s1547_s3 + $0x8] ss:$0 sm:$0xff] }
 0x6d8   :  { %v1205_v15 = vpop.eup %1204  ;;  %v601_v16 = vmul.f32 1.442695, %v597_v11  ;;  %v603_v23 = vmul.f32 1.442695, %v598_v20 }
 0x6d9   :  { %v1207_v17 = vpop.eup %1206  ;;  %v721_v18 = vmul.f32 1.442695, %v716_v14  ;;  %v605_v19 = vsel %vm585_vm8, %v1205_v15, 0.0 }
 0x6da   :  { %606 = vadd.xlane.f32.xlu0 %v605_v19  ;;  %v726_v21 = vsel %vm585_vm8, %v1207_v17, 0.0  ;;  %1208 = vpow2.f32 %v601_v16 }
 0x6db   :  { %727 = vadd.xlane.f32.xlu1 %v726_v21  ;;  %1210 = vpow2.f32 %v721_v18 }
 0x6dc   :  { %1212 = vpow2.f32 %v603_v23 }
 0x6e0   :  { %v1209_v24 = vpop.eup %1208 }
 0x6e1   :  { %v1211_v25 = vpop.eup %1210  ;;  %v608_v26 = vsel %vm585_vm8, %v1209_v24, 0.0 }
 0x6e2   :  { %v729_v27 = vsel %vm592_vm13, %v1211_v25, 0.0  ;;  %v1213_v28 = vpop.eup %1212 }
 0x6e3   :  { %609 = vadd.xlane.f32.xlu1 %v608_v26  ;;  %730 = vadd.xlane.f32.xlu2 %v729_v27  ;;  %v611_v29 = vsel %vm592_vm13, %v1213_v28, 0.0 }
 0x6eb   :  { %612 = vadd.xlane.f32.xlu2 %v611_v29 }
 0x745   :  { %v725_v31 = vpop.xlane.xlu2 %724 }
 0x746   :  { %1214 = vrcp.f32 %v725_v31 }
 0x74c   :  { %v1215_v32 = vpop.eup %1214 }
 0x74d   :  { %v735_v33 = vmul.f32 %v1215_v32, %v1203_v22  ;;  %v607_v34 = vpop.xlane.xlu0 %606 }
 0x74e   :  { %1216 = vrcp.f32 %v607_v34  ;;  %v728_v37 = vpop.xlane.xlu1 %727 }
 0x74f   :  { %1218 = vrcp.f32 %v728_v37  ;;  %1133 = vmatmul.msk.f32.vlgmr.msrb.gmra.mxu0 %vm585_vm8, %v735_v33 }
 0x754   :  { %v1217_v39 = vpop.eup %1216 }
 0x755   :  { %v1219_v41 = vpop.eup %1218  ;;  %v617_v42 = vmul.f32 %v1217_v39, %v1205_v15 }
 0x756   :  { %v610_v43 = vpop.xlane.xlu1 %609  ;;  %v736_v44 = vmul.f32 %v1219_v41, %v1207_v17  ;;  %v731_v45 = vpop.xlane.xlu2 %730 }
 0x757   :  { %1220 = vrcp.f32 %v610_v43  ;;  %1123 = vmatmul.msk.f32.vlgmr.msra.gmra.mxu1 %vm585_vm8, %v617_v42 }
 0x758   :  { %1222 = vrcp.f32 %v731_v45  ;;  %1134 = vmatmul.msk.f32.gmra.mxu0 %vm585_vm8, %v736_v44  ;;  %v1162_v45 = vld [vmem:[%s1546_s2 + $0x30] ss:$0 sm:$0xff] }
 0x75d   :  { %v1221_v48 = vpop.eup %1220 }
 0x75e   :  { %v1223_v49 = vpop.eup %1222  ;;  %v618_v50 = vmul.f32 %v1221_v48, %v1209_v24  ;;  %v613_v51 = vpop.xlane.xlu2 %612  ;;  %v479_v48 = vadd.f32 %v1162_v45, %v1427_v38 }
 0x75f   :  { %v737_v52 = vmul.f32 %v1223_v49, %v1211_v25  ;;  %1224 = vrcp.f32 %v613_v51 }
 0x760   :  { %1124 = vmatmul.msk.f32.gmra.mxu1 %vm585_vm8, %v618_v50  ;;  %v486_v50 = vmul.f32 0.01, %v479_v48  ;;  %vm483_vm7 = vcmp.gt.f32.partialorder %v479_v48, 0.0 }
 0x761   :  { %1135 = vmatmul.msk.f32.gmra.mxu0 %vm585_vm8, %v737_v52 }
 0x762   :  { %v489_v52 = vsel %vm483_vm7, %v479_v48, %v486_v50 }
 0x765   :  { %v1225_v53 = vpop.eup %1224 }
 0x766   :  { %v619_v54 = vmul.f32 %v1225_v53, %v1213_v28  ;;  %v1268_v28 = vmov 0   ;;  %v476_v53 = vadd.f32 %v1162_v45, %v1425_v36 }
 0x767   :  { %1158 = vset.pattern.permute.xlu0 %v1268_v28  ;;  %1159 = vset.pattern.permute.xlu1 %v1268_v28 }
 0x768   :  { %1125 = vmatmul.msk.f32.gmra.mxu1 %vm585_vm8, %v619_v54  ;;  %1160 = vset.pattern.permute.xlu2 %v1268_v28  ;;  %v485_v54 = vmul.f32 0.01, %v476_v53  ;;  %vm482_vm9 = vcmp.gt.f32.partialorder %v476_v53, 0.0 }
 0x7cc   :  { %v768_v55 = vpop.f32.mrf.mxu0 }
 0x7cd   :  { %780 = vrot.lane.b32.xlu0 %v768_v55, %s1267_s27  ;;  %v473_v55 = vadd.f32 %v1162_v45, %v1423_v35  ;;  %v966_v35 = vld [vmem:[%s1546_s2 + $0x60] sm:$0xff] }
 0x7cf   :  { %vm481_vm10 = vcmp.gt.f32.partialorder %v473_v55, 0.0 }
 0x7d4   :  { %v649_v60 = vpop.f32.mrf.mxu1 }
 0x7d5   :  { %v771_v56 = vpop.f32.mrf.mxu0 }
 0x7d6   :  { %782 = vrot.lane.b32.xlu1 %v771_v56, %s1267_s27  ;;  %v488_v56 = vsel %vm482_vm9, %v476_v53, %v485_v54 }
 0x7dd   :  { %v652_v63 = vpop.f32.mrf.mxu1 }
 0x7de   :  { %v774_v57 = vpop.f32.mrf.mxu0 }
 0x7df   :  { %784 = vrot.lane.b32.xlu2 %v774_v57, %s1267_s27  ;;  %v484_v57 = vmul.f32 0.01, %v473_v55 }
 0x7e1   :  { %v487_v58 = vsel %vm481_vm10, %v473_v55, %v484_v57 }
 0x7e5   :  { %v655_v6 = vpop.f32.mrf.mxu1 }
 0x839   :  { %v785_v10 = vpop.permute.xlu2 %784 }
 0x83a   :  { %v791_v30 = vsel %vm540_vm5, %v655_v6, %v785_v10  ;;  %v965_v10 = vld [vmem:[%s1546_s2 + $0x58] sm:$0xff] }
 0x83b   :  { %v795_v8 = vadd.f32 %v1163_v61, %v791_v30 }
 0x83d   :  { %v801_v11 = vmul.f32 0.01, %v795_v8  ;;  %vm798_vm4 = vcmp.gt.f32.partialorder %v795_v8, 0.0 }
 0x83f   :  { %v781_v62 = vpop.permute.xlu0 %780  ;;  %v804_v12 = vsel %vm798_vm4, %v795_v8, %v801_v11  ;;  %v1164_v8 = vld [vmem:[%s1547_s3 + $0x20] ss:$0 sm:$0xff] }
 0x840   :  { %v789_v0 = vsel %vm540_vm5, %v649_v60, %v781_v62 }
 0x841   :  { %v793_v1 = vadd.f32 %v1163_v61, %v789_v0 }
 0x843   :  { %vm796_vm0 = vcmp.gt.f32.partialorder %v793_v1, 0.0  ;;  %v799_v2 = vmul.f32 0.01, %v793_v1 }
 0x845   :  { %v802_v3 = vsel %vm796_vm0, %v793_v1, %v799_v2 }
 0x846   :  { %1136 = vmatmul.msk.f32.vlgmr.msrb.gmra.mxu2 %vm71_vm2, %v802_v3 }
 0x848   :  { %v783_v4 = vpop.permute.xlu1 %782 }
 0x849   :  { %v790_v5 = vsel %vm540_vm5, %v652_v63, %v783_v4  ;;  %v964_v4 = vld [vmem:[%s1546_s2 + $0x50] sm:$0xff] }
 0x84a   :  { %v794_v22 = vadd.f32 %v1163_v61, %v790_v5 }
 0x84c   :  { %vm797_vm1 = vcmp.gt.f32.partialorder %v794_v22, 0.0  ;;  %v800_v7 = vmul.f32 0.01, %v794_v22 }
 0x84e   :  { %v803_v9 = vsel %vm797_vm1, %v794_v22, %v800_v7 }
 0x84f   :  { %1137 = vmatmul.msk.f32.gmra.mxu2 %vm71_vm2, %v803_v9 }
 0x857   :  { %1138 = vmatmul.msk.f32.gmra.mxu2 %vm71_vm2, %v804_v12 }
 0x8c9   :  { %v831_v13 = vpop.f32.mrf.mxu2 }
 0x8d2   :  { %v834_v14 = vpop.f32.mrf.mxu2 }
 0x8da   :  { %v837_v15 = vpop.f32.mrf.mxu2 }
 0x8db   :  { %1139 = vmatpush.xpose.msk.msrb.mxu1 %vm367_vm15, %v837_v15  ;;  %1145 = vmatpush.msk.msrb.mxu3 %vm629_vm6, %v837_v15 }
 0x8dd   :  { %943 = vmatpush.msrb.mxu3 %v834_v14 }
 0x8df   :  { %1140 = vmatpush.xpose.msk.msrb.mxu1 %vm367_vm15, %v834_v14  ;;  %944 = vmatpush.msrb.mxu3 %v831_v13 }
 0x8e3   :  { %1141 = vmatpush.xpose.msk.msrb.mxu1 %vm367_vm15, %v831_v13 }
 0x8e6   :  { %1142 = vmatmul.msk.f32.vlgmr.msrb.gmra.mxu1 %vm367_vm15, %v831_v13 }
 0x8ee   :  { %1143 = vmatmul.msk.f32.gmra.mxu1 %vm367_vm15, %v834_v14 }
 0x8f6   :  { %1144 = vmatmul.msk.f32.gmra.mxu1 %vm367_vm15, %v837_v15 }
 0x963   :  { %v866_v16 = vpop.f32.mrf.mxu1 }
 0x964   :  { %v875_v17 = vmul.f32 %v866_v16, %v1432_v40 }
 0x966   :  { %vm878_vm2 = vcmp.eq.f32.partialorder %v875_v17, 0.0 }
 0x967   :  { %v881_v18 = vsel %vm878_vm2, -1e+16, %v875_v17 }
 0x968   :  { %v884_v19 = vsel %vm585_vm8, %v881_v18, -inf }
 0x969   :  { %885 = vmax.xlane.f32.xlu0 %v884_v19 }
 0x96b   :  { %v869_v20 = vpop.f32.mrf.mxu1 }
 0x96c   :  { %v876_v21 = vmul.f32 %v869_v20, %v1440_v46 }
 0x96e   :  { %vm879_vm5 = vcmp.eq.f32.partialorder %v876_v21, 0.0 }
 0x96f   :  { %v882_v23 = vsel %vm879_vm5, -1e+16, %v876_v21  ;;  %v967_v21 = vld [vmem:[%s1546_s2 + $0x68] sm:$0x3] }
 0x970   :  { %v887_v24 = vsel %vm585_vm8, %v882_v23, -inf }
 0x971   :  { %888 = vmax.xlane.f32.xlu1 %v887_v24 }
 0x973   :  { %v872_v25 = vpop.f32.mrf.mxu1 }
 0x974   :  { %v877_v26 = vmul.f32 %v872_v25, %v1445_v47 }
 0x976   :  { %vm880_vm15 = vcmp.eq.f32.partialorder %v877_v26, 0.0 }
 0x977   :  { %v883_v27 = vsel %vm880_vm15, -1e+16, %v877_v26  ;;  %v969_v26 = vld [vmem:[%s1547_s3 + $0x48] sm:$0xff] }
 0x978   :  { %v890_v40 = vsel %vm592_vm13, %v883_v27, -inf }
 0x979   :  { %891 = vmax.xlane.f32.xlu2 %v890_v40 }
 0x9dc   :  { %v886_v29 = vpop.xlane.xlu0 %885 }
 0x9dd   :  { %v893_v31 = vsub.f32 %v881_v18, %v886_v29 }
 0x9df   :  { %v896_v46 = vmul.f32 1.442695, %v893_v31 }
 0x9e1   :  { %1226 = vpow2.f32 %v896_v46  ;;  %v971_v46 = vld [vmem:[%s1547_s3 + $0x58] sm:$0x3] }
 0x9e4   :  { %v889_v32 = vpop.xlane.xlu1 %888 }
 0x9e5   :  { %v894_v33 = vsub.f32 %v882_v23, %v889_v32  ;;  %v970_v23 = vld [vmem:[%s1547_s3 + $0x50] sm:$0xf] }
 0x9e7   :  { %v1227_v34 = vpop.eup %1226  ;;  %v898_v37 = vmul.f32 1.442695, %v894_v33  ;;  %v1165_v33 = vld [vmem:[%s1546_s2 + $0x70] ss:$0 sm:$0xff] }
 0x9e8   :  { %v902_v39 = vsel %vm585_vm8, %v1227_v34, 0.0 }
 0x9e9   :  { %1228 = vpow2.f32 %v898_v37  ;;  %903 = vadd.xlane.f32.xlu0 %v902_v39 }
 0x9ec   :  { %v892_v47 = vpop.xlane.xlu2 %891 }
 0x9ed   :  { %v895_v41 = vsub.f32 %v883_v27, %v892_v47  ;;  %v968_v27 = vld [vmem:[%s1547_s3 + $0x40] sm:$0xff] }
 0x9ef   :  { %v1229_v42 = vpop.eup %1228  ;;  %v900_v43 = vmul.f32 1.442695, %v895_v41 }
 0x9f0   :  { %v905_v44 = vsel %vm585_vm8, %v1229_v42, 0.0 }
 0x9f1   :  { %1230 = vpow2.f32 %v900_v43  ;;  %906 = vadd.xlane.f32.xlu1 %v905_v44 }
 0x9f7   :  { %v1231_v49 = vpop.eup %1230 }
 0x9f8   :  { %v908_v51 = vsel %vm592_vm13, %v1231_v49, 0.0 }
 0x9f9   :  { %909 = vadd.xlane.f32.xlu2 %v908_v51 }
 0x9fd   :  { %985 = vperm.xlu0 %1158, %v489_v52  }
 0xa0a   :  { %980 = vperm.xlu1 %1159, %v488_v56  }
 0xa11   :  { %975 = vperm.xlu2 %1160, %v487_v58  }
 0xa5c   :  { %v904_v38 = vpop.xlane.xlu0 %903 }
 0xa5d   :  { %1232 = vrcp.f32 %v904_v38 }
 0xa63   :  { %v1233_v59 = vpop.eup %1232 }
 0xa64   :  { %v914_v60 = vmul.f32 %v1233_v59, %v1227_v34  ;;  %v907_v61 = vpop.xlane.xlu1 %906 }
 0xa65   :  { %1234 = vrcp.f32 %v907_v61 }
 0xa66   :  { %1146 = vmatmul.msk.f32.vlgmr.msrb.gmra.mxu3 %vm585_vm8, %v914_v60 }
 0xa6b   :  { %v1235_v62 = vpop.eup %1234 }
 0xa6c   :  { %v910_v36 = vpop.xlane.xlu2 %909  ;;  %v915_v63 = vmul.f32 %v1235_v62, %v1229_v42 }
 0xa6d   :  { %1236 = vrcp.f32 %v910_v36 }
 0xa6e   :  { %1147 = vmatmul.msk.f32.gmra.mxu3 %vm585_vm8, %v915_v63 }
 0xa6f   :  { %v986_v0 = vpop.permute.xlu0 %985 }
 0xa70   :  { %v990_v1 = vmul.f32 %v986_v0, %v966_v35 }
 0xa72   :  { %1051 = vmatpush.msra.mxu2 %v990_v1 }
 0xa73   :  { %v1237_v2 = vpop.eup %1236 }
 0xa74   :  { %v916_v3 = vmul.f32 %v1237_v2, %v1231_v49  ;;  %v976_v5 = vpop.permute.xlu2 %975 }
 0xa75   :  { %v988_v30 = vmul.f32 %v976_v5, %v964_v4 }
 0xa76   :  { %1148 = vmatmul.msk.f32.gmra.mxu3 %vm585_vm8, %v916_v3 }
 0xa7c   :  { %v981_v6 = vpop.permute.xlu1 %980 }
 0xa7d   :  { %v989_v22 = vmul.f32 %v981_v6, %v965_v10 }
 0xa7f   :  { %1052 = vmatpush.msra.mxu2 %v989_v22 }
 0xa81   :  { %1053 = vmatpush.msra.mxu2 %v988_v30 }
 0xa82   :  { %1151 = vmatmul.msk.f32.vlgmr.msra.gmra.mxu2 %vm116_vm3, %v967_v21  ;;  %vm1060_vm3 = vcmask 66560  }
 0xae9   :  { %v946_v7 = vpop.f32.mrf.mxu3 }
 0xaea   :  { %v947_v17 = vadd.f32 %v1164_v8, %v946_v7 }
 0xaec   :  { %v958_v19 = vmul.f32 0.01, %v947_v17  ;;  %vm955_vm13 = vcmp.gt.f32.partialorder %v947_v17, 0.0 }
 0xaee   :  { %v961_v20 = vsel %vm955_vm13, %v947_v17, %v958_v19 }
 0xaf1   :  { %v949_v9 = vpop.f32.mrf.mxu3 }
 0xaf2   :  { %v950_v11 = vadd.f32 %v1164_v8, %v949_v9 }
 0xaf4   :  { %v959_v12 = vmul.f32 0.01, %v950_v11  ;;  %vm956_vm11 = vcmp.gt.f32.partialorder %v950_v11, 0.0 }
 0xaf6   :  { %v962_v13 = vsel %vm956_vm11, %v950_v11, %v959_v12 }
 0xaf7   :  { %998 = vperm.xlu1 %1159, %v962_v13  }
 0xaf9   :  { %v952_v14 = vpop.f32.mrf.mxu3 }
 0xafa   :  { %v953_v15 = vadd.f32 %v1164_v8, %v952_v14 }
 0xafc   :  { %v960_v16 = vmul.f32 0.01, %v953_v15  ;;  %vm957_vm12 = vcmp.gt.f32.partialorder %v953_v15, 0.0 }
 0xafe   :  { %v963_v18 = vsel %vm957_vm12, %v953_v15, %v960_v16 }
 0xaff   :  { %1003 = vperm.xlu2 %1160, %v963_v18  }
 0xb05   :  { %v1055_v32 = vpop.f32.mrf.mxu2 }
 0xb07   :  { %993 = vperm.xlu2 %1160, %v961_v20  }
 0xb59   :  { %v1004_v24 = vpop.permute.xlu2 %1003 }
 0xb5a   :  { %v1008_v25 = vmul.f32 %v1004_v24, %v970_v23 }
 0xb5c   :  { %1149 = vmatpush.msk.msra.mxu0 %vm629_vm6, %v1008_v25 }
 0xb61   :  { %v994_v40 = vpop.permute.xlu2 %993 }
 0xb62   :  { %v1006_v31 = vmul.f32 %v994_v40, %v968_v27 }
 0xb69   :  { %v999_v28 = vpop.permute.xlu1 %998 }
 0xb6a   :  { %v1007_v29 = vmul.f32 %v999_v28, %v969_v26 }
 0xb6c   :  { %1029 = vmatpush.msra.mxu0 %v1007_v29 }
 0xb6e   :  { %1030 = vmatpush.msra.mxu0 %v1006_v31 }
 0xb6f   :  { %1150 = vmatmul.msk.f32.vlgmr.msra.gmra.mxu0 %vm585_vm8, %v971_v46 }
 0xbec   :  { %v1032_v34 = vpop.f32.mrf.mxu0 }
 0xbed   :  { %v1056_v37 = vadd.f32 %v1055_v32, %v1032_v34 }
 0xbef   :  { %v1059_v39 = vadd.f32 %v1165_v33, %v1056_v37 }
 0xbf1   :  { %1061 = vst.msk [vmem:[#allocation2] sm:$0x3] %vm1060_vm3, %v1059_v39 }
 0xbf2   :  { %1072 = dma.vmem_to_hbm [thread:$0]  %s1068_s29, 32, %s1070_s6, [#allocation3]  }
 0xbf3   :  { %1262 = dma.done.wait [#allocation3], 32  }
 0xbf4   :  { %1263 = vsyncadd [#allocation3], 4294967264 }
 0xbf5   :  { %1077 = vsyncpa [#allocation3], 1 }

</bundles_post_ra>
